<compile_context>
chip_gen: v7x
topology: tpu7x:2x2x1
jax: 0.10.0
libtpu: 0.0.40
codegen_flags: <defaults>
</compile_context>

<pallas_src>
import numpy as np

import jax
import jax.numpy as jnp
from jax.experimental import pallas as pl
from jax.experimental.pallas import tpu as pltpu

EPS = 1e-8
LANES = 128
_BLOCK_BYTES = 2 << 20          # ~2 MiB of f32 per input block (review item 1)
_VMEM_LIMIT = 32 * 1024 * 1024  # 2 inputs x 2 buffers x ~2 MiB + output + slack


# ---------------------------------------------------------------------------
# Fused Pallas kernel: per-(batch, lane) partial sums of four BCE statistics.
#   stat 0: sum(target)
#   stat 1: sum(sigmoid(pred))
#   stat 2: sum(-target * log(sigmoid(pred)))            (unweighted "tp")
#   stat 3: sum(-(1 - target) * log(1 - sigmoid(pred)))  (unweighted "fn")
# Grid = (n_splits "parallel", blocks_per_split "arbitrary").  The output
# block (1, 4, B, 128) stays VMEM-resident across the inner axis, so the
# update is a cheap read-modify-write with one HBM writeback per split.
# ---------------------------------------------------------------------------
def _bce_stats_kernel(pred_ref, targ_ref, out_ref):
    i = pl.program_id(1)

    @pl.when(i == 0)
    def _():
        out_ref[...] = jnp.zeros_like(out_ref)

    x = pred_ref[...].astype(jnp.float32)   # (B, S, 128) logits (f32 after upcast)
    t = targ_ref[...].astype(jnp.float32)   # (B, S, 128) targets in [0, 1]

    # Shared-exp, numerically stable formulation:
    #   e = exp(-|x|)
    #   sigmoid(x)           = where(x >= 0, 1, e) / (1 + e)
    #   -log(sigmoid(x))     = softplus(-x) = log(1 + e) + relu(-x)
    #   -log(1 - sigmoid(x)) = softplus( x) = softplus(-x) + x
    # NOTE: exact softplus (no +1e-8 inside the log) -- deviates from PyTorch
    # only for saturated logits |x| >~ 18 where PyTorch clamps at ~18.4.
    e = jnp.exp(-jnp.abs(x))
    log1pe = jnp.log(1.0 + e)
    p = jnp.where(x >= 0.0, 1.0, e) * pl.reciprocal(1.0 + e, approx=False)
    sp_neg = log1pe + jnp.maximum(-x, 0.0)
    sp_pos = sp_neg + x
    tp = t * sp_neg
    fn = (1.0 - t) * sp_pos

    # One fused (4, B, 128) RMW instead of four masked sub-8-sublane updates.
    out_ref[0] = out_ref[0] + jnp.stack(
        [jnp.sum(t, axis=1), jnp.sum(p, axis=1),
         jnp.sum(tp, axis=1), jnp.sum(fn, axis=1)], axis=0)


def _stats_xla(pred_flat, targ_flat):
    """Same four statistics computed directly in XLA.  (B, M) -> (4, B)."""
    x = pred_flat.astype(jnp.float32)
    t = targ_flat.astype(jnp.float32)
    e = jnp.exp(-jnp.abs(x))
    log1pe = jnp.log(1.0 + e)
    p = jnp.where(x >= 0.0, 1.0, e) / (1.0 + e)
    sp_neg = log1pe + jnp.maximum(-x, 0.0)
    sp_pos = sp_neg + x
    return jnp.stack([
        jnp.sum(t, axis=1),
        jnp.sum(p, axis=1),
        jnp.sum(t * sp_neg, axis=1),
        jnp.sum((1.0 - t) * sp_pos, axis=1),
    ], axis=0)


def _make_in_map(blocks_per_split):
    def in_map(s, i):
        return (0, s * blocks_per_split + i, 0)
    return in_map


def _entry_stats(pred_flat, targ_flat, max_block_rows=None):
    """Per-batch BCE statistics [sum_t, sum_p, sum_tp, sum_fn], shape (4, B).

    pred_flat / targ_flat: (B, N) in any float dtype (streamed as-is, upcast to
    f32 inside the kernel).  Large, block-aligned prefixes go through the
    Pallas kernel; the tail (and tiny levels) are reduced directly in XLA so
    no padding is ever materialized.
    """
    b, n = pred_flat.shape
    r_full = n // LANES                                   # complete 128-lane rows
    s_cap = max(8, (_BLOCK_BYTES // (b * LANES * 4)) // 8 * 8)
    if max_block_rows is not None:
        s_cap = min(s_cap, max(8, (max_block_rows // 8) * 8))
    s_block = min(s_cap, (r_full // 8) * 8)

    stats = jnp.zeros((4, b), jnp.float32)
    main = 0
    if s_block >= 8:
        n_blocks = r_full // s_block
        main_rows = n_blocks * s_block
        main = main_rows * LANES
        # v7x: split evenly across the two TensorCores when possible; harmless
        # (same total work, one extra tiny output slot) on v5e / v6e.
        n_splits = 2 if (n_blocks >= 2 and n_blocks % 2 == 0) else 1
        bps = n_blocks // n_splits

        pred_main = pred_flat[:, :main].reshape(b, main_rows, LANES)
        targ_main = targ_flat[:, :main].reshape(b, main_rows, LANES)

        out = pl.pallas_call(
            _bce_stats_kernel,
            out_shape=jax.ShapeDtypeStruct((n_splits, 4, b, LANES), jnp.float32),
            grid_spec=pltpu.PrefetchScalarGridSpec(
                num_scalar_prefetch=0,
                grid=(n_splits, bps),
                in_specs=[
                    pl.BlockSpec((b, s_block, LANES), _make_in_map(bps)),
                    pl.BlockSpec((b, s_block, LANES), _make_in_map(bps)),
                ],
                out_specs=pl.BlockSpec((1, 4, b, LANES),
                                       lambda s, i: (s, 0, 0, 0)),
            ),
            compiler_params=pltpu.CompilerParams(
                dimension_semantics=("parallel", "arbitrary"),
                vmem_limit_bytes=_VMEM_LIMIT),
        )(pred_main, targ_main)
        stats = stats + jnp.sum(out, axis=(0, 3))         # (4, B)

    if main < n:
        # Tail (and whole tiny levels): a handful of elements -> plain XLA.
        stats = stats + _stats_xla(pred_flat[:, main:], targ_flat[:, main:])
    return stats


# ---------------------------------------------------------------------------
# JAX glue: adaptive pooling + multi-level loss combination.
# ---------------------------------------------------------------------------
def _adaptive_pool_matrix(out_size, in_size):
    a = np.zeros((out_size, in_size), np.float32)
    for i in range(out_size):
        s = (i * in_size) // out_size
        e = -(-((i + 1) * in_size) // out_size)  # ceil division
        a[i, s:e] = 1.0 / (e - s)
    return jnp.asarray(a)


def adaptive_avg_pool2d(x, out_hw):
    # Exact PyTorch F.adaptive_avg_pool2d semantics via pooling matrices.
    h, w = out_hw
    ah = _adaptive_pool_matrix(h, x.shape[2])
    aw = _adaptive_pool_matrix(w, x.shape[3])
    return jnp.einsum('hH,bcHW,wW->bchw', ah, x, aw)


def multi_levels_binary_cross_entropy(preds_dict, target, weights,
                                      balance=False, reduction='sum'):
    assert preds_dict.keys() == weights.keys(), \
        'Error: Keys of prediction do not match keys of weights!'
    b = target.shape[0]

    loss = 0.0
    num_preds = 1
    for k in weights.keys():
        cur_pred = preds_dict[k] if isinstance(preds_dict[k], (tuple, list)) \
            else [preds_dict[k]]
        num_preds = len(cur_pred)            # PyTorch semantics: last level wins
        h, w = cur_pred[0].shape[2:]
        cur_weight = weights[k]
        cur_target = adaptive_avg_pool2d(target, (h, w)).reshape(b, h * w)
        for pred in cur_pred:
            assert pred.shape[0] == b and pred.shape[1] == 1
            assert tuple(pred.shape[2:]) == (h, w)
            stats = _entry_stats(pred.reshape(b, h * w), cur_target)   # (4, B)
            sum_t, sum_p = stats[0], stats[1]
            sum_tp, sum_fn = stats[2], stats[3]
            if balance:
                tp_w = 0.5 * h * w / (sum_t + sum_p + EPS)
                fn_w = 0.5 * h * w / ((h * w - sum_t) + (h * w - sum_p) + EPS)
            else:
                tp_w = 1.0
                fn_w = 1.0
            total = jnp.sum(tp_w * sum_tp + fn_w * sum_fn)
            if reduction == 'mean':
                lvl_loss = total / (b * h * w)
            elif reduction == 'sum':
                lvl_loss = total / b
            else:
                # TODO(synk): reduction='none' would need the full bce map back
                # from the kernel; MultiLevelBCE only allows 'mean' / 'sum'.
                raise ValueError(reduction)
            loss = loss + lvl_loss * cur_weight
    return loss / num_preds


class MultiLevelBCE:
    def __init__(self,
                 weights=dict(level6=0.32, level5=0.08, level4=0.02,
                              level3=0.01, level2=0.005),
                 balance=False, reduction='sum'):
        assert isinstance(balance, bool)
        assert isinstance(weights, dict)
        assert reduction in ('mean', 'sum')
        self.weights = weights
        self.balance = balance
        self.reduction = reduction

    def __call__(self, preds_dict, target):
        return multi_levels_binary_cross_entropy(
            preds_dict, target, weights=self.weights,
            balance=self.balance, reduction=self.reduction)


# ---------------------------------------------------------------------------
# Pure-JAX reference (mirrors the PyTorch code line-by-line) for validation.
# ---------------------------------------------------------------------------
def _bce_ref(pred, target, balance, reduction):
    b = pred.shape[0]
    h, w = pred.shape[2:]
    pred = jax.nn.sigmoid(pred)
    if balance:
        tp_w = 0.5 * h * w / (jnp.sum(target, axis=(1, 2, 3)) +
                              jnp.sum(pred, axis=(1, 2, 3)) + EPS)
        fn_w = 0.5 * h * w / (jnp.sum(1 - target, axis=(1, 2, 3)) +
                              jnp.sum(1 - pred, axis=(1, 2, 3)) + EPS)
    else:
        tp_w = jnp.ones((b,)); fn_w = jnp.ones((b,))
    tp = -target * jnp.log(pred + EPS) * tp_w.reshape(b, 1, 1, 1)
    fn = -(1 - target) * jnp.log(1 - pred + EPS) * fn_w.reshape(b, 1, 1, 1)
    bce_map = tp + fn
    if reduction == 'mean':
        return jnp.mean(bce_map)
    return jnp.sum(bce_map) / b


def _multi_level_ref(preds_dict, target, weights, balance, reduction):
    loss = 0.0
    num_preds = 1
    for k in weights.keys():
        cur_pred = preds_dict[k] if isinstance(preds_dict[k], (tuple, list)) \
            else [preds_dict[k]]
        num_preds = len(cur_pred)
        h, w = cur_pred[0].shape[2:]
        cur_target = adaptive_avg_pool2d(target, (h, w))
        for pred in cur_pred:
            loss += _bce_ref(pred, cur_target, balance, reduction) * weights[k]
    return loss / num_preds


if __name__ == "__main__":
    key = jax.random.PRNGKey(0)
    B = 2
    k_t, k2, k2b, k3, k4, k5, k6, kx, ky = jax.random.split(key, 9)

    # Ground-truth occlusion map in [0, 1], shape (B, 1, H, W).
    target = jax.random.uniform(k_t, (B, 1, 64, 64), dtype=jnp.float32)

    weights = dict(level6=0.32, level5=0.08, level4=0.02,
                   level3=0.01, level2=0.005)
    preds_dict = {
        'level6': jax.random.normal(k6, (B, 1, 2, 2), dtype=jnp.float32),
        'level5': jax.random.normal(k5, (B, 1, 4, 4), dtype=jnp.float32),
        'level4': jax.random.normal(k4, (B, 1, 8, 8), dtype=jnp.float32),
        'level3': jax.random.normal(k3, (B, 1, 16, 16), dtype=jnp.float32),
        'level2': jax.random.normal(k2, (B, 1, 32, 32), dtype=jnp.float32),
    }

    # --- test 1: default config (balance=False, reduction='sum') -------------
    loss_fn = MultiLevelBCE(weights=weights, balance=False, reduction='sum')
    loss = jax.block_until_ready(
        jax.jit(lambda p, t: loss_fn(p, t))(preds_dict, target))
    ref = jax.block_until_ready(
        _multi_level_ref(preds_dict, target, weights, False, 'sum'))
    assert np.allclose(np.asarray(loss), np.asarray(ref),
                       rtol=1e-5, atol=1e-5), (loss, ref)

    # --- test 2: balance=True, reduction='mean', level2 given as a list ------
    preds_dict_list = dict(preds_dict)
    preds_dict_list['level2'] = [
        preds_dict['level2'],
        jax.random.normal(k2b, (B, 1, 32, 32), dtype=jnp.float32),
    ]
    loss_fn_bal = MultiLevelBCE(weights=weights, balance=True, reduction='mean')
    loss_b = jax.block_until_ready(
        jax.jit(lambda p, t: loss_fn_bal(p, t))(preds_dict_list, target))
    ref_b = jax.block_until_ready(
        _multi_level_ref(preds_dict_list, target, weights, True, 'mean'))
    assert np.allclose(np.asarray(loss_b), np.asarray(ref_b),
                       rtol=1e-5, atol=1e-5), (loss_b, ref_b)

    # --- test 3: multi-block accumulation, 2-way split, tail, bf16 streaming -
    n_big = 32 * LANES + 100
    pred_big = jax.random.normal(kx, (B, n_big), dtype=jnp.float32).astype(jnp.bfloat16)
    targ_big = jax.random.uniform(ky, (B, n_big), dtype=jnp.float32)
    s_kern = jax.block_until_ready(
        jax.jit(lambda p, t: _entry_stats(p, t, max_block_rows=8))(pred_big, targ_big))
    s_ref = jax.block_until_ready(_stats_xla(pred_big, targ_big))
    assert np.allclose(np.asarray(s_kern), np.asarray(s_ref),
                       rtol=1e-4, atol=1e-4), (s_kern, s_ref)

    print("KERNEL_OK")
</pallas_src>

<mosaic_0001>
module attributes {stable_mosaic.version = 11 : i64} {
  func.func @_bce_stats_kernel(%arg0: i32, %arg1: i32, %arg2: memref<2x8x128xf32, #tpu.memory_space<vmem>>, %arg3: memref<2x8x128xf32, #tpu.memory_space<vmem>>, %arg4: memref<1x4x2x128xf32, #tpu.memory_space<vmem>>) attributes {dimension_semantics = [#tpu.dimension_semantics<parallel>, #tpu.dimension_semantics<arbitrary>], iteration_bounds = array<i64: 1, 1>, scalar_prefetch = 0 : i64, scratch_operands = 0 : i64, tpu.core_type = #tpu.core_type<tc>, window_params = [{transform_indices = @transform_0, window_bounds = array<i64: 2, 8, 128>}, {transform_indices = @transform_1, window_bounds = array<i64: 2, 8, 128>}, {transform_indices = @transform_2, window_bounds = array<i64: 1, 4, 2, 128>}]} {
    %c0_i32 = arith.constant 0 : i32
    %0 = arith.cmpi eq, %arg1, %c0_i32 : i32
    %1 = arith.extui %0 : i1 to i32
    %c0_i32_0 = arith.constant 0 : i32
    %2 = arith.cmpi ne, %1, %c0_i32_0 : i32
    scf.if %2 {
      %cst_25 = arith.constant 0.000000e+00 : f32
      %45 = vector.broadcast %cst_25 : f32 to vector<1x4x2x128xf32>
      %c0_26 = arith.constant 0 : index
      %c0_27 = arith.constant 0 : index
      %c0_28 = arith.constant 0 : index
      %c0_29 = arith.constant 0 : index
      %46 = vector.load %arg4[%c0_26, %c0_27, %c0_28, %c0_29] : memref<1x4x2x128xf32, #tpu.memory_space<vmem>>, vector<1x4x2x128xf32>
      tpu.vector_store %arg4[%c0_26, %c0_27, %c0_28, %c0_29], %45 {strides = array<i32>} : memref<1x4x2x128xf32, #tpu.memory_space<vmem>>, vector<1x4x2x128xf32>,
    } else {
    }
    %c0 = arith.constant 0 : index
    %c0_1 = arith.constant 0 : index
    %c0_2 = arith.constant 0 : index
    %3 = vector.load %arg2[%c0, %c0_1, %c0_2] : memref<2x8x128xf32, #tpu.memory_space<vmem>>, vector<2x8x128xf32>
    %c0_3 = arith.constant 0 : index
    %c0_4 = arith.constant 0 : index
    %c0_5 = arith.constant 0 : index
    %4 = vector.load %arg3[%c0_3, %c0_4, %c0_5] : memref<2x8x128xf32, #tpu.memory_space<vmem>>, vector<2x8x128xf32>
    %5 = math.absf %3 : vector<2x8x128xf32>
    %cst = arith.constant 0.000000e+00 : f32
    %6 = vector.broadcast %cst : f32 to vector<2x8x128xf32>
    %7 = arith.subf %6, %5 : vector<2x8x128xf32>
    %8 = math.exp %7 : vector<2x8x128xf32>
    %cst_6 = arith.constant 1.000000e+00 : f32
    %9 = vector.broadcast %cst_6 : f32 to vector<2x8x128xf32>
    %10 = arith.addf %9, %8 : vector<2x8x128xf32>
    %11 = math.log %10 : vector<2x8x128xf32>
    %cst_7 = arith.constant 0.000000e+00 : f32
    %12 = vector.broadcast %cst_7 : f32 to vector<2x8x128xf32>
    %13 = arith.cmpf oge, %3, %12 : vector<2x8x128xf32>
    %cst_8 = arith.constant 1.000000e+00 : f32
    %14 = vector.broadcast %cst_8 : f32 to vector<2x8x128xf32>
    %15 = arith.select %13, %14, %8 : vector<2x8x128xi1>, vector<2x8x128xf32>
    %cst_9 = arith.constant 1.000000e+00 : f32
    %16 = vector.broadcast %cst_9 : f32 to vector<2x8x128xf32>
    %17 = arith.addf %16, %8 : vector<2x8x128xf32>
    %18 = tpu.reciprocal %17 : vector<2x8x128xf32> -> vector<2x8x128xf32>
    %19 = arith.mulf %15, %18 : vector<2x8x128xf32>
    %cst_10 = arith.constant 0.000000e+00 : f32
    %20 = vector.broadcast %cst_10 : f32 to vector<2x8x128xf32>
    %21 = arith.subf %20, %3 : vector<2x8x128xf32>
    %cst_11 = arith.constant 0.000000e+00 : f32
    %22 = vector.broadcast %cst_11 : f32 to vector<2x8x128xf32>
    %23 = arith.maximumf %21, %22 : vector<2x8x128xf32>
    %24 = arith.addf %11, %23 : vector<2x8x128xf32>
    %25 = arith.addf %24, %3 : vector<2x8x128xf32>
    %26 = arith.mulf %4, %24 : vector<2x8x128xf32>
    %cst_12 = arith.constant 1.000000e+00 : f32
    %27 = vector.broadcast %cst_12 : f32 to vector<2x8x128xf32>
    %28 = arith.subf %27, %4 : vector<2x8x128xf32>
    %29 = arith.mulf %28, %25 : vector<2x8x128xf32>
    %c0_13 = arith.constant 0 : index
    %c0_14 = arith.constant 0 : index
    %c0_15 = arith.constant 0 : index
    %c0_16 = arith.constant 0 : index
    %30 = vector.load %arg4[%c0_13, %c0_14, %c0_15, %c0_16] : memref<1x4x2x128xf32, #tpu.memory_space<vmem>>, vector<1x4x2x128xf32>
    %31 = vector.shape_cast %30 : vector<1x4x2x128xf32> to vector<4x2x128xf32>
    %cst_17 = arith.constant dense<0.000000e+00> : vector<2x128xf32>
    %32 = vector.multi_reduction <add>, %4, %cst_17 [1] : vector<2x8x128xf32> to vector<2x128xf32>
    %cst_18 = arith.constant dense<0.000000e+00> : vector<2x128xf32>
    %33 = vector.multi_reduction <add>, %19, %cst_18 [1] : vector<2x8x128xf32> to vector<2x128xf32>
    %cst_19 = arith.constant dense<0.000000e+00> : vector<2x128xf32>
    %34 = vector.multi_reduction <add>, %26, %cst_19 [1] : vector<2x8x128xf32> to vector<2x128xf32>
    %cst_20 = arith.constant dense<0.000000e+00> : vector<2x128xf32>
    %35 = vector.multi_reduction <add>, %29, %cst_20 [1] : vector<2x8x128xf32> to vector<2x128xf32>
    %36 = vector.shape_cast %32 : vector<2x128xf32> to vector<1x2x128xf32>
    %37 = vector.shape_cast %33 : vector<2x128xf32> to vector<1x2x128xf32>
    %38 = vector.shape_cast %34 : vector<2x128xf32> to vector<1x2x128xf32>
    %39 = vector.shape_cast %35 : vector<2x128xf32> to vector<1x2x128xf32>
    %40 = tpu.concatenate %36, %37, %38, %39 in 0 : vector<1x2x128xf32>, vector<1x2x128xf32>, vector<1x2x128xf32>, vector<1x2x128xf32> -> vector<4x2x128xf32>
    %41 = arith.addf %31, %40 : vector<4x2x128xf32>
    %c0_21 = arith.constant 0 : index
    %c0_22 = arith.constant 0 : index
    %c0_23 = arith.constant 0 : index
    %c0_24 = arith.constant 0 : index
    %42 = vector.load %arg4[%c0_21, %c0_22, %c0_23, %c0_24] : memref<1x4x2x128xf32, #tpu.memory_space<vmem>>, vector<1x4x2x128xf32>
    %43 = vector.shape_cast %42 : vector<1x4x2x128xf32> to vector<4x2x128xf32>
    %44 = vector.shape_cast %41 : vector<4x2x128xf32> to vector<1x4x2x128xf32>
    tpu.vector_store %arg4[%c0_21, %c0_22, %c0_23, %c0_24], %44 {strides = array<i32>} : memref<1x4x2x128xf32, #tpu.memory_space<vmem>>, vector<1x4x2x128xf32>,
    return
  }
  func.func @transform_0(%arg0: i32, %arg1: i32) -> (i32, i32, i32) {
    %c1_i32 = arith.constant 1 : i32
    %0 = arith.muli %arg0, %c1_i32 : i32
    %1 = arith.addi %0, %arg1 : i32
    %c0_i32 = arith.constant 0 : i32
    %c0_i32_0 = arith.constant 0 : i32
    %c0_i32_1 = arith.constant 0 : i32
    return %c0_i32, %1, %c0_i32_0 : i32, i32, i32
  }
  func.func @transform_1(%arg0: i32, %arg1: i32) -> (i32, i32, i32) {
    %c1_i32 = arith.constant 1 : i32
    %0 = arith.muli %arg0, %c1_i32 : i32
    %1 = arith.addi %0, %arg1 : i32
    %c0_i32 = arith.constant 0 : i32
    %c0_i32_0 = arith.constant 0 : i32
    %c0_i32_1 = arith.constant 0 : i32
    return %c0_i32, %1, %c0_i32_0 : i32, i32, i32
  }
  func.func @transform_2(%arg0: i32, %arg1: i32) -> (i32, i32, i32, i32) {
    %c0_i32 = arith.constant 0 : i32
    %c0_i32_0 = arith.constant 0 : i32
    %c0_i32_1 = arith.constant 0 : i32
    %c0_i32_2 = arith.constant 0 : i32
    return %arg0, %c0_i32, %c0_i32_0, %c0_i32_1 : i32, i32, i32, i32
  }
}

</mosaic_0001>

<bundles_post_ra>
// kernel: _lambda_.1
= control target key start
LH: loop header
LB: loop body
LE: loop exit
PB: predicated region body
PF: predicated region fallthrough
CT: control target
= control target key end

     0   :  { %v203_v0 = vmov 0.0   ;;  %vm154_vm0 = vcmask 1041409   ;;  %s283_s2 = inlined_call_operand.vmem [shape: f32[1,4,2,128], index: 2, kind: output, shape index: {}]   ;;  %s284_s1 = inlined_call_operand.vmem [shape: f32[2,8,128], index: 1, kind: input, shape index: {}]   ;;  %s285_s0 = inlined_call_operand.vmem [shape: f32[2,8,128], index: 0, kind: input, shape index: {}]  }
   0x1   :  { %49 = vst [vmem:[%s283_s2] sm:$0x3] %v203_v0  ;;  %50 = vst [vmem:[%s283_s2 + $0x2] sm:$0x3] %v203_v0  ;;  %v234_v1 = vld [vmem:[%s284_s1] sm:$0xff]  ;;  %v239_v2 = vld [vmem:[%s284_s1 + $0x8] sm:$0xff] }
   0x2   :  { %51 = vst [vmem:[%s283_s2 + $0x4] sm:$0x3] %v203_v0  ;;  %52 = vst [vmem:[%s283_s2 + $0x6] sm:$0x3] %v203_v0  ;;  %v53_v3 = vld [vmem:[%s285_s0] sm:$0xff]  ;;  %v97_v4 = vrot.slane %v234_v1, 4 }
   0x3   :  { %v103_v5 = vrot.slane %v239_v2, 4  ;;  %v54_v6 = vld [vmem:[%s285_s0 + $0x8] sm:$0xff]  ;;  %v57_v7 = vand.u32 2147483647, %v53_v3  ;;  %vm71_vm1 = vcmp.ge.f32.partialorder %v53_v3, 0.0  ;;  %v79_v31 = vsub.f32 0.0, %v53_v3 }
   0x4   :  { %v58_v8 = vand.u32 2147483647, %v54_v6  ;;  %v98_v9 = vadd.f32 %v97_v4, %v234_v1  ;;  %vm72_vm2 = vcmp.ge.f32.partialorder %v54_v6, 0.0  ;;  %v80_v33 = vsub.f32 0.0, %v54_v6 }
   0x5   :  { %v104_v10 = vadd.f32 %v103_v5, %v239_v2  ;;  %v59_v11 = vsub.f32 0.0, %v57_v7  ;;  %v81_v38 = vmax.f32 %v79_v31, 0.0  ;;  %v89_v49 = vsub.f32 1.0, %v234_v1 }
   0x6   :  { %v60_v12 = vsub.f32 0.0, %v58_v8  ;;  %v99_v13 = vrot.slane %v98_v9, 2  ;;  %v82_v41 = vmax.f32 %v80_v33, 0.0  ;;  %v90_v52 = vsub.f32 1.0, %v239_v2 }
   0x7   :  { %v105_v14 = vrot.slane %v104_v10, 2  ;;  %v61_v15 = vmul.f32 1.442695, %v59_v11 }
   0x8   :  { %v63_v16 = vmul.f32 1.442695, %v60_v12  ;;  %v100_v17 = vadd.f32 %v99_v13, %v98_v9  ;;  %v93_v23 = vld [vmem:[%s283_s2] sm:$0x3] }
   0x9   :  { %v106_v18 = vadd.f32 %v105_v14, %v104_v10  ;;  %191 = vpow2.f32 %v61_v15  ;;  %v94_v15 = vld [vmem:[%s283_s2 + $0x2] sm:$0x3] }
   0xa   :  { %193 = vpow2.f32 %v63_v16  ;;  %v101_v19 = vrot.slane %v100_v17, 1 }
   0xb   :  { %v107_v20 = vrot.slane %v106_v18, 1 }
   0xc   :  { %v102_v21 = vadd.f32 %v101_v19, %v100_v17 }
   0xd   :  { %v108_v22 = vadd.f32 %v107_v20, %v106_v18 }
   0xf   :  { %v153_v24 = vrot.slane %v108_v22, 7 }
  0x11   :  { %v155_v25 = vsel %vm154_vm0, %v153_v24, %v102_v21 }
  0x12   :  { %v166_v26 = vadd.f32 %v155_v25, %v93_v23 }
  0x13   :  { %v192_v27 = vpop.eup %191 }
  0x14   :  { %v194_v28 = vpop.eup %193  ;;  %170 = vst [vmem:[%s283_s2] sm:$0x3] %v166_v26  ;;  %v65_v29 = vadd.f32 1.0, %v192_v27  ;;  %v73_v32 = vsel %vm71_vm1, 1.0, %v192_v27 }
  0x15   :  { %v66_v30 = vadd.f32 1.0, %v194_v28  ;;  %v74_v34 = vsel %vm72_vm2, 1.0, %v194_v28 }
  0x16   :  { %195 = vrcp.f32 %v65_v29 }
  0x17   :  { %197 = vrcp.f32 %v66_v30 }
  0x18   :  { %199 = vlog2.f32 %v65_v29  ;;  %v95_v29 = vld [vmem:[%s283_s2 + $0x4] sm:$0x3] }
  0x19   :  { %201 = vlog2.f32 %v66_v30 }
  0x20   :  { %v196_v35 = vpop.eup %195 }
  0x21   :  { %v198_v36 = vpop.eup %197  ;;  %v77_v37 = vmul.f32 %v196_v35, %v73_v32 }
  0x22   :  { %v200_v39 = vpop.eup %199  ;;  %v78_v40 = vmul.f32 %v198_v36, %v74_v34  ;;  %v96_v34 = vld [vmem:[%s283_s2 + $0x6] sm:$0x3] }
  0x23   :  { %v202_v42 = vpop.eup %201  ;;  %v109_v43 = vrot.slane %v77_v37, 4  ;;  %v68_v44 = vmul.f32 0.6931472, %v200_v39 }
  0x24   :  { %v115_v45 = vrot.slane %v78_v40, 4  ;;  %v70_v46 = vmul.f32 0.6931472, %v202_v42 }
  0x25   :  { %v110_v47 = vadd.f32 %v109_v43, %v77_v37  ;;  %v83_v48 = vadd.f32 %v81_v38, %v68_v44 }
  0x26   :  { %v116_v50 = vadd.f32 %v115_v45, %v78_v40  ;;  %v84_v51 = vadd.f32 %v82_v41, %v70_v46 }
  0x27   :  { %v111_v53 = vrot.slane %v110_v47, 2  ;;  %v87_v54 = vmul.f32 %v83_v48, %v234_v1  ;;  %v85_v55 = vadd.f32 %v83_v48, %v53_v3 }
  0x28   :  { %v117_v56 = vrot.slane %v116_v50, 2  ;;  %v88_v57 = vmul.f32 %v84_v51, %v239_v2  ;;  %v86_v58 = vadd.f32 %v84_v51, %v54_v6 }
  0x29   :  { %v112_v59 = vadd.f32 %v111_v53, %v110_v47  ;;  %v121_v60 = vrot.slane %v87_v54, 4  ;;  %v91_v61 = vmul.f32 %v89_v49, %v85_v55 }
  0x2a   :  { %v118_v62 = vadd.f32 %v117_v56, %v116_v50  ;;  %v127_v63 = vrot.slane %v88_v57, 4  ;;  %v92_v0 = vmul.f32 %v90_v52, %v86_v58 }
  0x2b   :  { %v113_v4 = vrot.slane %v112_v59, 1  ;;  %v122_v5 = vadd.f32 %v121_v60, %v87_v54  ;;  %v133_v7 = vrot.slane %v91_v61, 4 }
  0x2c   :  { %v119_v8 = vrot.slane %v118_v62, 1  ;;  %v128_v9 = vadd.f32 %v127_v63, %v88_v57  ;;  %v139_v10 = vrot.slane %v92_v0, 4 }
  0x2d   :  { %v123_v11 = vrot.slane %v122_v5, 2  ;;  %v134_v12 = vadd.f32 %v133_v7, %v91_v61  ;;  %v114_v1 = vadd.f32 %v113_v4, %v112_v59 }
  0x2e   :  { %v120_v3 = vadd.f32 %v119_v8, %v118_v62  ;;  %v129_v13 = vrot.slane %v128_v9, 2  ;;  %v140_v14 = vadd.f32 %v139_v10, %v92_v0 }
  0x2f   :  { %v124_v2 = vadd.f32 %v123_v11, %v122_v5  ;;  %v135_v6 = vrot.slane %v134_v12, 2 }
  0x30   :  { %v156_v16 = vrot.slane %v120_v3, 7  ;;  %v130_v17 = vadd.f32 %v129_v13, %v128_v9  ;;  %v141_v18 = vrot.slane %v140_v14, 2 }
  0x31   :  { %v125_v19 = vrot.slane %v124_v2, 1  ;;  %v136_v20 = vadd.f32 %v135_v6, %v134_v12 }
  0x32   :  { %v157_v21 = vsel %vm154_vm0, %v156_v16, %v114_v1  ;;  %v131_v22 = vrot.slane %v130_v17, 1  ;;  %v142_v23 = vadd.f32 %v141_v18, %v140_v14 }
  0x33   :  { %v167_v24 = vadd.f32 %v157_v21, %v94_v15  ;;  %v137_v25 = vrot.slane %v136_v20, 1  ;;  %v126_v26 = vadd.f32 %v125_v19, %v124_v2 }
  0x34   :  { %v132_v27 = vadd.f32 %v131_v22, %v130_v17  ;;  %v143_v28 = vrot.slane %v142_v23, 1 }
  0x35   :  { %171 = vst [vmem:[%s283_s2 + $0x2] sm:$0x3] %v167_v24  ;;  %v138_v31 = vadd.f32 %v137_v25, %v136_v20 }
  0x36   :  { %v158_v30 = vrot.slane %v132_v27, 7  ;;  %v144_v32 = vadd.f32 %v143_v28, %v142_v23 }
  0x38   :  { %v159_v33 = vsel %vm154_vm0, %v158_v30, %v126_v26  ;;  %v160_v35 = vrot.slane %v144_v32, 7 }
  0x39   :  { %v168_v36 = vadd.f32 %v159_v33, %v95_v29 }
  0x3a   :  { %v161_v37 = vsel %vm154_vm0, %v160_v35, %v138_v31 }
  0x3b   :  { %172 = vst [vmem:[%s283_s2 + $0x4] sm:$0x3] %v168_v36  ;;  %v169_v38 = vadd.f32 %v161_v37, %v96_v34 }
  0x3d   :  { %173 = vst [vmem:[%s283_s2 + $0x6] sm:$0x3] %v169_v38 }

</bundles_post_ra>
